<compile_context>
chip_gen: v7x
topology: tpu7x:2x2x1
jax: 0.10.0
libtpu: 0.0.40
codegen_flags: <defaults>
</compile_context>

<pallas_src>
import functools

import jax
import jax.numpy as jnp
from jax.experimental import pallas as pl
from jax.experimental.pallas import tpu as pltpu

HIDDEN = 15        # real hidden width of the PyTorch module
HIDDEN_PAD = 128   # zero-padded, lane-dense hidden width used in-kernel
OUT = 1


def _round_up(x, m):
    return ((x + m - 1) // m) * m


def _cdiv(a, b):
    return -(-a // b)


def _vmem_capacity_bytes():
    """Best-effort query of per-core VMEM capacity; falls back to 128 MiB."""
    try:
        return int(pltpu.get_tpu_info().vmem_capacity_bytes)
    except Exception:
        return 128 * 1024 * 1024   # v5e / v6e physical VMEM


def _pick_config(batch, input_dim, x_itemsize):
    """Choose (block_m, vmem_limit_bytes), generation-aware.

    block_m is sized so each grid step moves a multi-MB x tile (amortising the
    ~0.35 us per-step overhead), bounded by the real VMEM footprint: the
    lane-padded x tile (double-buffered), the (block_m, 128) f32 layer-1
    intermediates, the double-buffered output row, and the weight tiles.
    """
    vmem_cap = _vmem_capacity_bytes()
    if vmem_cap >= 100 * 1024 * 1024:            # v5e / v6e: 128 MiB physical
        vmem_limit = 64 * 1024 * 1024
        n_tc = 1                                  # single TensorCore per chip
    else:                                         # v7x: 64 MiB per TC, 2 TCs
        vmem_limit = min(48 * 1024 * 1024, (vmem_cap * 3) // 4)
        n_tc = 2

    lane_d = _round_up(input_dim, 128)            # x tile is lane-padded in VMEM
    x_row = lane_d * x_itemsize                   # bytes per x row in VMEM
    h_row = 3 * HIDDEN_PAD * 4                    # layer-1 f32 intermediates
    per_row = 2 * x_row + h_row + 2 * 4           # 2x double-buffered x; out x2
    fixed = 2 * lane_d * HIDDEN_PAD * x_itemsize + 64 * 1024   # w1 (x2) + misc
    budget = vmem_limit - fixed - 6 * 1024 * 1024              # safety margin

    cap_rows = max(8, min(32768, budget // per_row))
    cap_rows -= cap_rows % (128 if cap_rows >= 128 else 8)

    if batch < 8:
        # block == full array dims is legal for tiny batches.
        return int(batch), int(vmem_limit)

    steps = _cdiv(batch, cap_rows)
    if n_tc > 1 and batch >= 256:
        steps = max(steps, n_tc)                  # give both v7x TCs a tile
    bm = _cdiv(batch, steps)
    bm = _round_up(bm, 128 if bm >= 128 else 8)
    bm = min(bm, cap_rows)
    return int(bm), int(vmem_limit)


def _mlp_kernel(x_ref, w1_ref, b1_ref, w2_ref, b2_ref, o_ref):
    x = x_ref[...]                                            # (block_m, D)

    # Layer 1 (MXU): (block_m, D) @ (D, 128) -> (block_m, 128); bias+ReLU on VPU.
    h = jnp.dot(x, w1_ref[...], preferred_element_type=jnp.float32)
    h = jnp.maximum(h + b1_ref[...], 0.0)

    # Layer 2: contract the padded hidden dim of both operands so the result is
    # lane-dense along the batch: (8, 128) . (block_m, 128)^T -> (8, block_m).
    # Only row 0 of w2_ref is live; rows 1..7 are zero sublane padding. The
    # transposed contraction is the MXU transposed-RHS form (pl.dot trans_b),
    # not an XLU transpose of the large h operand.
    z = jax.lax.dot_general(
        w2_ref[...], h,
        dimension_numbers=(((1,), (1,)), ((), ())),
        preferred_element_type=jnp.float32)                   # (8, block_m)
    z = z[0:1, :] + b2_ref[...]                               # (1, block_m)

    # Sigmoid: exp on the EUP; exact reciprocal over just (1, block_m) values.
    # NOTE: padded tail rows may hold garbage (exp of garbage) — they are
    # discarded by the wrapper and never reduced over, so this is safe.
    y = pl.reciprocal(1.0 + jnp.exp(-z), approx=False)
    o_ref[0] = y.astype(o_ref.dtype)                          # lane-dense store


@functools.partial(jax.jit, static_argnames=("block_m", "vmem_limit"))
def _forward(x, w1p, b1p, w2p, b2p, *, block_m, vmem_limit):
    B, D = x.shape
    x = x.astype(w1p.dtype)            # no-op when dtypes already match
    bm = block_m
    grid_m = _cdiv(B, bm)

    out = pl.pallas_call(
        _mlp_kernel,
        out_shape=jax.ShapeDtypeStruct((grid_m, 1, bm), jnp.float32),
        grid_spec=pltpu.PrefetchScalarGridSpec(
            num_scalar_prefetch=0,
            grid=(grid_m,),
            in_specs=[
                pl.BlockSpec((bm, D), lambda i: (i, 0)),           # x tile
                pl.BlockSpec((D, HIDDEN_PAD), lambda i: (0, 0)),   # w1 (whole)
                pl.BlockSpec((1, HIDDEN_PAD), lambda i: (0, 0)),   # b1
                pl.BlockSpec((8, HIDDEN_PAD), lambda i: (0, 0)),   # w2 (row 0 live)
                pl.BlockSpec((1, 1), lambda i: (0, 0)),            # b2
            ],
            out_specs=pl.BlockSpec((1, 1, bm), lambda i: (i, 0, 0)),
        ),
        compiler_params=pltpu.CompilerParams(
            dimension_semantics=("parallel",),
            vmem_limit_bytes=int(vmem_limit),
        ),
    )(x, w1p, b1p, w2p, b2p)

    # (grid_m, 1, bm) -> (B, 1); garbage rows past B in the last tile discarded.
    return out.reshape(grid_m * bm)[:B].reshape(B, OUT)


def prepare_params(w1, b1, w2, b2, dtype=jnp.float32):
    """One-time zero-padding of the weights to lane/sublane-friendly shapes.

    Hoisted out of the per-call forward so no padding traffic / extra XLA pad
    kernels are paid per step. Padded hidden columns stay exactly zero through
    ReLU and contribute zero to layer 2, so the padding is numerically exact.

    Weights are stored transposed relative to torch.nn.Linear:
      w1: (D, 15), b1: (1, 15) or (15,), w2: (15, 1) or (15,), b2: scalar-ish.

    Pass dtype=jnp.bfloat16 to halve HBM traffic on x/w1 (opt-in; changes
    numerics slightly vs the f32 PyTorch reference).
    """
    D = w1.shape[0]
    w1p = jnp.zeros((D, HIDDEN_PAD), dtype).at[:, :HIDDEN].set(w1.astype(dtype))
    b1p = jnp.zeros((1, HIDDEN_PAD), jnp.float32).at[:, :HIDDEN].set(
        jnp.asarray(b1, jnp.float32).reshape(1, HIDDEN))
    w2p = jnp.zeros((8, HIDDEN_PAD), jnp.float32).at[0, :HIDDEN].set(
        jnp.asarray(w2, jnp.float32).reshape(HIDDEN))
    b2p = jnp.asarray(b2, jnp.float32).reshape(1, 1)
    return w1p, b1p, w2p, b2p


def step_ramp_classifier(x, params, *, block_m=None):
    """x: (B, D) -> (B, 1), matching StepRampClassifier.forward.

    `params` is the tuple returned by prepare_params (padded once, up front).
    """
    B, D = x.shape
    w1p = params[0]
    if w1p.shape[0] != D:
        raise ValueError(f"params prepared for D={w1p.shape[0]}, got D={D}")
    itemsize = jnp.dtype(w1p.dtype).itemsize
    bm, vmem_limit = _pick_config(B, D, itemsize)
    if block_m is not None:
        bm = int(block_m)
        if B >= 8 and bm % 8 != 0:
            raise ValueError("block_m must be a multiple of 8")
    return _forward(x, *params, block_m=bm, vmem_limit=vmem_limit)


def init_params(key, input_dim):
    """Deterministic init mimicking nn.Linear's uniform(-1/sqrt(fan_in), +)."""
    k1, k2, k3, k4 = jax.random.split(key, 4)
    bound1 = 1.0 / jnp.sqrt(input_dim)
    bound2 = 1.0 / jnp.sqrt(HIDDEN)
    w1 = jax.random.uniform(k1, (input_dim, HIDDEN), jnp.float32, -bound1, bound1)
    b1 = jax.random.uniform(k2, (1, HIDDEN), jnp.float32, -bound1, bound1)
    w2 = jax.random.uniform(k3, (HIDDEN, OUT), jnp.float32, -bound2, bound2)
    b2 = jax.random.uniform(k4, (1, OUT), jnp.float32, -bound2, bound2)
    return w1, b1, w2, b2


def _reference(x, w1, b1, w2, b2):
    h = jnp.maximum(x @ w1 + b1, 0.0)
    return jax.nn.sigmoid(h @ w2 + b2)


if __name__ == "__main__":
    key = jax.random.PRNGKey(0)
    kx, kp = jax.random.split(key)

    batch, input_dim = 256, 32
    x = jax.random.normal(kx, (batch, input_dim), jnp.float32)
    w1, b1, w2, b2 = init_params(kp, input_dim)
    params = prepare_params(w1, b1, w2, b2)          # one-time weight padding

    out = jax.block_until_ready(step_ramp_classifier(x, params))
    ref = _reference(x, w1, b1, w2, b2)
    assert out.shape == (batch, 1)
    assert jnp.allclose(out, ref, atol=2e-5, rtol=2e-5)

    # Ragged batch: exercises the padded-tail-discard path.
    x2 = jax.random.normal(jax.random.PRNGKey(1), (100, input_dim), jnp.float32)
    out2 = jax.block_until_ready(step_ramp_classifier(x2, params))
    assert out2.shape == (100, 1)
    assert jnp.allclose(out2, _reference(x2, w1, b1, w2, b2), atol=2e-5, rtol=2e-5)

    print("KERNEL_OK")
</pallas_src>

<mosaic_0001>
module attributes {stable_mosaic.version = 11 : i64} {
  func.func @_mlp_kernel(%arg0: i32, %arg1: memref<256x32xf32, #tpu.memory_space<vmem>>, %arg2: memref<32x128xf32, #tpu.memory_space<vmem>>, %arg3: memref<1x128xf32, #tpu.memory_space<vmem>>, %arg4: memref<8x128xf32, #tpu.memory_space<vmem>>, %arg5: memref<1x1xf32, #tpu.memory_space<vmem>>, %arg6: memref<1x1x256xf32, #tpu.memory_space<vmem>>) attributes {dimension_semantics = [#tpu.dimension_semantics<parallel>], iteration_bounds = array<i64: 1>, scalar_prefetch = 0 : i64, scratch_operands = 0 : i64, tpu.core_type = #tpu.core_type<tc>, window_params = [{transform_indices = @transform_0, window_bounds = array<i64: 256, 32>}, {pipeline_mode = #tpu.pipeline_mode<synchronous>, transform_indices = @transform_1, window_bounds = array<i64: 32, 128>}, {pipeline_mode = #tpu.pipeline_mode<synchronous>, transform_indices = @transform_2, window_bounds = array<i64: 1, 128>}, {pipeline_mode = #tpu.pipeline_mode<synchronous>, transform_indices = @transform_3, window_bounds = array<i64: 8, 128>}, {pipeline_mode = #tpu.pipeline_mode<synchronous>, transform_indices = @transform_4, window_bounds = array<i64: 1, 1>}, {transform_indices = @transform_5, window_bounds = array<i64: 1, 1, 256>}]} {
    %c0 = arith.constant 0 : index
    %c0_0 = arith.constant 0 : index
    %0 = vector.load %arg1[%c0, %c0_0] : memref<256x32xf32, #tpu.memory_space<vmem>>, vector<256x32xf32>
    %c0_1 = arith.constant 0 : index
    %c0_2 = arith.constant 0 : index
    %1 = vector.load %arg2[%c0_1, %c0_2] : memref<32x128xf32, #tpu.memory_space<vmem>>, vector<32x128xf32>
    %cst = arith.constant dense<0.000000e+00> : vector<256x128xf32>
    %2 = tpu.matmul %0, %1, %cst {dimension_numbers = #tpu.dot_dimension_numbers<[1], [0], [0], [1], [0, 0, 1, 1], [], []>} : vector<256x32xf32>, vector<32x128xf32>, vector<256x128xf32> -> vector<256x128xf32>
    %c0_3 = arith.constant 0 : index
    %c0_4 = arith.constant 0 : index
    %3 = vector.load %arg3[%c0_3, %c0_4] : memref<1x128xf32, #tpu.memory_space<vmem>>, vector<1x128xf32>
    %4 = vector.broadcast %3 : vector<1x128xf32> to vector<256x128xf32>
    %5 = arith.addf %2, %4 : vector<256x128xf32>
    %cst_5 = arith.constant 0.000000e+00 : f32
    %6 = vector.broadcast %cst_5 : f32 to vector<256x128xf32>
    %7 = arith.maximumf %5, %6 : vector<256x128xf32>
    %c0_6 = arith.constant 0 : index
    %c0_7 = arith.constant 0 : index
    %8 = vector.load %arg4[%c0_6, %c0_7] : memref<8x128xf32, #tpu.memory_space<vmem>>, vector<8x128xf32>
    %cst_8 = arith.constant dense<0.000000e+00> : vector<8x256xf32>
    %9 = tpu.matmul %8, %7, %cst_8 {dimension_numbers = #tpu.dot_dimension_numbers<[1], [1], [0], [0], [0, 0, 1, 0], [], []>} : vector<8x128xf32>, vector<256x128xf32>, vector<8x256xf32> -> vector<8x256xf32>
    %10 = vector.extract_strided_slice %9 {offsets = [0, 0], sizes = [1, 256], strides = [1, 1]} : vector<8x256xf32> to vector<1x256xf32>
    %c0_9 = arith.constant 0 : index
    %c0_10 = arith.constant 0 : index
    %11 = vector.load %arg5[%c0_9, %c0_10] : memref<1x1xf32, #tpu.memory_space<vmem>>, vector<1x1xf32>
    %12 = vector.broadcast %11 : vector<1x1xf32> to vector<1x256xf32>
    %13 = arith.addf %10, %12 : vector<1x256xf32>
    %cst_11 = arith.constant 0.000000e+00 : f32
    %14 = vector.broadcast %cst_11 : f32 to vector<1x256xf32>
    %15 = arith.subf %14, %13 : vector<1x256xf32>
    %16 = math.exp %15 : vector<1x256xf32>
    %cst_12 = arith.constant 1.000000e+00 : f32
    %17 = vector.broadcast %cst_12 : f32 to vector<1x256xf32>
    %18 = arith.addf %17, %16 : vector<1x256xf32>
    %19 = tpu.reciprocal %18 : vector<1x256xf32> -> vector<1x256xf32>
    %c0_13 = arith.constant 0 : index
    %c0_14 = arith.constant 0 : index
    %c0_15 = arith.constant 0 : index
    %20 = vector.load %arg6[%c0_13, %c0_14, %c0_15] : memref<1x1x256xf32, #tpu.memory_space<vmem>>, vector<1x1x256xf32>
    %21 = vector.shape_cast %20 : vector<1x1x256xf32> to vector<1x256xf32>
    %22 = vector.shape_cast %19 : vector<1x256xf32> to vector<1x1x256xf32>
    tpu.vector_store %arg6[%c0_13, %c0_14, %c0_15], %22 {strides = array<i32>} : memref<1x1x256xf32, #tpu.memory_space<vmem>>, vector<1x1x256xf32>,
    return
  }
  func.func @transform_0(%arg0: i32) -> (i32, i32) {
    %c0_i32 = arith.constant 0 : i32
    %c0_i32_0 = arith.constant 0 : i32
    return %arg0, %c0_i32 : i32, i32
  }
  func.func @transform_1(%arg0: i32) -> (i32, i32) {
    %c0_i32 = arith.constant 0 : i32
    %c0_i32_0 = arith.constant 0 : i32
    %c0_i32_1 = arith.constant 0 : i32
    return %c0_i32, %c0_i32_0 : i32, i32
  }
  func.func @transform_2(%arg0: i32) -> (i32, i32) {
    %c0_i32 = arith.constant 0 : i32
    %c0_i32_0 = arith.constant 0 : i32
    %c0_i32_1 = arith.constant 0 : i32
    return %c0_i32, %c0_i32_0 : i32, i32
  }
  func.func @transform_3(%arg0: i32) -> (i32, i32) {
    %c0_i32 = arith.constant 0 : i32
    %c0_i32_0 = arith.constant 0 : i32
    %c0_i32_1 = arith.constant 0 : i32
    return %c0_i32, %c0_i32_0 : i32, i32
  }
  func.func @transform_4(%arg0: i32) -> (i32, i32) {
    %c0_i32 = arith.constant 0 : i32
    %c0_i32_0 = arith.constant 0 : i32
    %c0_i32_1 = arith.constant 0 : i32
    return %c0_i32, %c0_i32_0 : i32, i32
  }
  func.func @transform_5(%arg0: i32) -> (i32, i32, i32) {
    %c0_i32 = arith.constant 0 : i32
    %c0_i32_0 = arith.constant 0 : i32
    %c0_i32_1 = arith.constant 0 : i32
    return %arg0, %c0_i32, %c0_i32_0 : i32, i32, i32
  }
}

</mosaic_0001>

<bundles_post_ra>
// kernel: _forward.1
= control target key start
LH: loop header
LB: loop body
LE: loop exit
PB: predicated region body
PF: predicated region fallthrough
CT: control target
= control target key end

     0   :  { %s1140_s0 = inlined_call_operand.hbm [shape: f32[256,32], index: 0, kind: input, shape index: {}]   ;;  %s1141_s1 = inlined_call_operand.hbm [shape: f32[32,128], index: 1, kind: input, shape index: {}]   ;;  %s1142_s2 = inlined_call_operand.hbm [shape: f32[1,128], index: 2, kind: input, shape index: {}]   ;;  %s1143_s3 = inlined_call_operand.hbm [shape: f32[8,128], index: 3, kind: input, shape index: {}]   ;;  %s1144_s4 = inlined_call_operand.<no memory space> [shape: f32[1,1], index: 4, kind: input, shape index: {}]   ;;  %s1145_s5 = inlined_call_operand.hbm [shape: f32[1,1,256], index: 5, kind: output, shape index: {}]  }
   0x1   :  { %v10_v0 = vstv %s1144_s4 }
   0x2   :  { %11 = vst [vmem:[#allocation2] sm:$0x1] %v10_v0 }
   0x3   :  { %12 = vsyncpa [#allocation4], 0 }
   0x4   :  { %13 = vsyncpa [#allocation7], 0 }
   0x5   :  { %14 = vsyncpa [#allocation10], 0 }
   0x6   :  { %15 = vsyncpa [#allocation5], 0  ;;  %s940_s20 = smov [#allocation6]   ;;  %s941_s22 = smov [#allocation3]  }
   0x7   :  { %s33_s21 = sshll.u32 %s940_s20, 4  ;;  %s21_s23 = sshll.u32 %s941_s22, 4  ;;  %s34_s21 = int_to_ptr.vmem [resolvable:$true] %s33_s21  ;;  %s982_s23 = int_to_ptr.vmem [resolvable:$true] %s21_s23 }
   0x8   :  { %s822_s26 = scalar_lea.hbm %s1141_s1, 512 }
   0x9   :  { %p823_p0 = scmp.ne.s32.totalorder %s1141_s1, %s822_s26  ;;  %p826_p1 = scmp.lt.u32.totalorder %s822_s26, %s1141_s1 }
   0xb   :  { %p828_p2 = pnand %p826_p1, %p823_p0 }
   0xd   :  { %831 = shalt.err (!%p828_p2)
}
   0xe   :  { %s832_s30 = scalar_lea.vmem %s34_s21, 512  ;;  %p837_p4 = scmp.lt.s32.totalorder %s34_s21, %s34_s21 }
   0xf   :  { %p833_p3 = scmp.ne.s32.totalorder %s34_s21, %s832_s30  ;;  %p838_p5 = scmp.lt.s32.totalorder %s832_s30, %s832_s30 }
  0x11   :  { %p839_p6 = por %p838_p5, %p837_p4 }
  0x13   :  { %p840_p7 = pnand %p839_p6, %p833_p3 }
  0x15   :  { %843 = shalt.err (!%p840_p7)
}
  0x16   :  { %s942_s6 = smov 128   ;;  %s943_s7 = smov 8  }
  0x17   :  { %39 = dma.hbm_to_vmem [thread:$0]  %s1141_s1, 512, %s34_s21, [#allocation7], %s942_s6, %s942_s6, %s943_s7  }
  0x18   :  { %s844_s12 = scalar_lea.hbm %s1140_s0, 4096 }
  0x19   :  { %p845_p8 = scmp.ne.s32.totalorder %s1140_s0, %s844_s12  ;;  %p848_p9 = scmp.lt.u32.totalorder %s844_s12, %s1140_s0 }
  0x1b   :  { %p850_p10 = pnand %p848_p9, %p845_p8 }
  0x1d   :  { %853 = shalt.err (!%p850_p10)
}
  0x1e   :  { %s854_s17 = scalar_lea.vmem %s982_s23, 4096  ;;  %p859_p12 = scmp.lt.s32.totalorder %s982_s23, %s982_s23 }
  0x1f   :  { %p855_p11 = scmp.ne.s32.totalorder %s982_s23, %s854_s17  ;;  %p860_p13 = scmp.lt.s32.totalorder %s854_s17, %s854_s17 }
  0x21   :  { %p861_p0 = por %p860_p13, %p859_p12 }
  0x23   :  { %p862_p1 = pnand %p861_p0, %p855_p11 }
  0x25   :  { %865 = shalt.err (!%p862_p1)
}
  0x26   :  { %27 = dma.hbm_to_vmem [thread:$0]  %s1140_s0, 4096, %s982_s23, [#allocation4], %s942_s6, %s942_s6, %s943_s7  }
  0x27   :  { %s944_s19 = smov [#allocation8]   ;;  %s945_s21 = smov [#allocation9]  }
  0x28   :  { %s46_s20 = sshll.u32 %s944_s19, 4  ;;  %s56_s22 = sshll.u32 %s945_s21, 4  ;;  %s47_s20 = int_to_ptr.vmem [resolvable:$true] %s46_s20  ;;  %s57_s22 = int_to_ptr.vmem [resolvable:$true] %s56_s22 }
  0x29   :  { %s866_s26 = scalar_lea.hbm %s1142_s2, 16 }
  0x2a   :  { %p867_p2 = scmp.ne.s32.totalorder %s1142_s2, %s866_s26  ;;  %p870_p3 = scmp.lt.u32.totalorder %s866_s26, %s1142_s2 }
  0x2c   :  { %p872_p4 = pnand %p870_p3, %p867_p2 }
  0x2e   :  { %875 = shalt.err (!%p872_p4)
}
  0x2f   :  { %s876_s0 = scalar_lea.vmem %s47_s20, 16  ;;  %s880_s23 = scalar_lea.vmem %s47_s20, 32 }
  0x30   :  { %p877_p5 = scmp.ne.s32.totalorder %s47_s20, %s876_s0  ;;  %p881_p6 = scmp.lt.s32.totalorder %s47_s20, %s47_s20 }
  0x31   :  { %p882_p7 = scmp.lt.s32.totalorder %s880_s23, %s876_s0 }
  0x33   :  { %p883_p8 = por %p882_p7, %p881_p6 }
  0x35   :  { %p884_p9 = pnand %p883_p8, %p877_p5 }
  0x37   :  { %887 = shalt.err (!%p884_p9)
}
  0x38   :  { %49 = dma.hbm_to_vmem [thread:$0]  %s1142_s2, 16, %s47_s20, [#allocation7]  }
  0x39   :  { %s888_s9 = scalar_lea.hbm %s1143_s3, 128 }
  0x3a   :  { %p889_p10 = scmp.ne.s32.totalorder %s1143_s3, %s888_s9  ;;  %p892_p11 = scmp.lt.u32.totalorder %s888_s9, %s1143_s3 }
  0x3c   :  { %p894_p12 = pnand %p892_p11, %p889_p10 }
  0x3e   :  { %897 = shalt.err (!%p894_p12)
}
  0x3f   :  { %s898_s14 = scalar_lea.vmem %s57_s22, 128  ;;  %p903_p0 = scmp.lt.s32.totalorder %s57_s22, %s57_s22 }
  0x40   :  { %p899_p13 = scmp.ne.s32.totalorder %s57_s22, %s898_s14  ;;  %p904_p1 = scmp.lt.s32.totalorder %s898_s14, %s898_s14 }
  0x42   :  { %p905_p2 = por %p904_p1, %p903_p0 }
  0x44   :  { %p906_p3 = pnand %p905_p2, %p899_p13 }
  0x46   :  { %909 = shalt.err (!%p906_p3)
}
  0x47   :  { %59 = dma.hbm_to_vmem [thread:$0]  %s1143_s3, 128, %s57_s22, [#allocation10]  }
  0x48   :  { %932 = dma.done.wait [#allocation4], 4096  }
  0x49   :  { %933 = vsyncadd [#allocation4], 4294963200 }
  0x4a   :  { %934 = dma.done.wait [#allocation7], 528  }
  0x4b   :  { %935 = vsyncadd [#allocation7], 4294966768 }
  0x4c   :  { %936 = dma.done.wait [#allocation10], 128  }
  0x4d   :  { %937 = vsyncadd [#allocation10], 4294967168  ;;  %vm117_vm0 = vcmask 261120   ;;  %v106_v1 = vld [vmem:[#allocation6] sm:$0xff]  ;;  %v107_v2 = vld [vmem:[#allocation6 + $0x8] sm:$0xff]  ;;  %v946_v41 = vmov 0  }
  0x4e   :  { %v108_v3 = vld [vmem:[#allocation6 + $0x10] sm:$0xff]  ;;  %v764_v4 = vpack.c.bf16 %v107_v2, %v106_v1  ;;  %v109_v5 = vld [vmem:[#allocation6 + $0x18] sm:$0xff]  ;;  %v74_v6 = vld [vmem:[#allocation3] sm:$0xff]  ;;  %813 = vset.pattern.permute.xlu0 %v946_v41  ;;  %s948_s3 = smov [#allocation11]  }
  0x4f   :  { %v768_v7 = vpack.c.bf16 %v109_v5, %v108_v3  ;;  %716 = vmatprep.mubr.msk.f32.mxu0 %vm117_vm0, %v74_v6  ;;  %v75_v8 = vld [vmem:[#allocation3 + $0x8] sm:$0xff]  ;;  %v76_v9 = vld [vmem:[#allocation3 + $0x10] sm:$0xff]  ;;  %v77_v10 = vld [vmem:[#allocation3 + $0x18] sm:$0xff]  ;;  %s594_s16 = sshll.u32 %s948_s3, 4  ;;  %s595_s16 = int_to_ptr.vmem [resolvable:$true] %s594_s16 }
  0x50   :  { %765 = vmatprep.subr.bf16.mxu0 %v764_v4  ;;  %v78_v11 = vld [vmem:[#allocation3 + $0x20] sm:$0xff]  ;;  %v79_v12 = vld [vmem:[#allocation3 + $0x28] sm:$0xff]  ;;  %v80_v13 = vld [vmem:[#allocation3 + $0x30] sm:$0xff]  ;;  %s910_s17 = scalar_lea.vmem %s595_s16, 32  ;;  %p915_p5 = scmp.lt.s32.totalorder %s595_s16, %s595_s16 }
  0x51   :  { %767 = vmatpush3.bf16.msra.mxu0 %v764_v4  ;;  %v81_v14 = vld [vmem:[#allocation3 + $0x38] sm:$0xff]  ;;  %v82_v15 = vld [vmem:[#allocation3 + $0x40] sm:$0xff]  ;;  %v83_v16 = vld [vmem:[#allocation3 + $0x48] sm:$0xff]  ;;  %p911_p4 = scmp.ne.s32.totalorder %s595_s16, %s910_s17  ;;  %p916_p6 = scmp.lt.s32.totalorder %s910_s17, %s910_s17 }
  0x52   :  { %769 = vmatprep.subr.bf16.mxu0 %v768_v7  ;;  %v84_v17 = vld [vmem:[#allocation3 + $0x50] sm:$0xff]  ;;  %v85_v18 = vld [vmem:[#allocation3 + $0x58] sm:$0xff]  ;;  %v86_v19 = vld [vmem:[#allocation3 + $0x60] sm:$0xff] }
  0x53   :  { %v87_v20 = vld [vmem:[#allocation3 + $0x68] sm:$0xff]  ;;  %v88_v21 = vld [vmem:[#allocation3 + $0x70] sm:$0xff]  ;;  %v89_v22 = vld [vmem:[#allocation3 + $0x78] sm:$0xff]  ;;  %p917_p7 = por %p916_p6, %p915_p5 }
  0x54   :  { %v90_v23 = vld [vmem:[#allocation3 + $0x80] sm:$0xff]  ;;  %v91_v24 = vld [vmem:[#allocation3 + $0x88] sm:$0xff]  ;;  %v92_v25 = vld [vmem:[#allocation3 + $0x90] sm:$0xff] }
  0x55   :  { %771 = vmatpush3.bf16.msra.mxu0 %v768_v7  ;;  %v93_v26 = vld [vmem:[#allocation3 + $0x98] sm:$0xff]  ;;  %v94_v27 = vld [vmem:[#allocation3 + $0xa0] sm:$0xff]  ;;  %v95_v28 = vld [vmem:[#allocation3 + $0xa8] sm:$0xff]  ;;  %p918_p8 = pnand %p917_p7, %p911_p4 }
  0x56   :  { %v96_v29 = vld [vmem:[#allocation3 + $0xb0] sm:$0xff]  ;;  %v97_v30 = vld [vmem:[#allocation3 + $0xb8] sm:$0xff]  ;;  %v98_v31 = vld [vmem:[#allocation3 + $0xc0] sm:$0xff] }
  0x57   :  { %v99_v32 = vld [vmem:[#allocation3 + $0xc8] sm:$0xff]  ;;  %v100_v33 = vld [vmem:[#allocation3 + $0xd0] sm:$0xff]  ;;  %v101_v34 = vld [vmem:[#allocation3 + $0xd8] sm:$0xff] }
  0x58   :  { %717 = vmatmul.mubr.msk.f32.vlgmr.msra.gmra.mrb[0].mxu0 %vm117_vm0, %v75_v8  ;;  %v102_v35 = vld [vmem:[#allocation3 + $0xe0] sm:$0xff]  ;;  %v103_v36 = vld [vmem:[#allocation3 + $0xe8] sm:$0xff]  ;;  %v104_v37 = vld [vmem:[#allocation3 + $0xf0] sm:$0xff] }
  0x59   :  { %719 = vmatprep.mubr.msk.f32.mxu0 %vm117_vm0, %v76_v9  ;;  %v105_v38 = vld [vmem:[#allocation3 + $0xf8] sm:$0xff]  ;;  %v1069_v39 = vld [vmem:[#allocation9] sm:$0xff]  ;;  %v1072_v42 = vld [vmem:[#allocation8] ss:$0 sm:$0xff] }
  0x5a   :  { %706 = vmatprep.mubr.f32.mxu1 %v1069_v39  ;;  %v543_v40 = vld [vmem:[#allocation2] sm:$0x1] }
  0x5b   :  { %546 = vperm.xlu0 %813, %v543_v40  }
  0x5c   :  { %720 = vmatmul.mubr.msk.f32.gmra.mrb[2].mxu0 %vm117_vm0, %v77_v10 }
  0x5d   :  { %722 = vmatprep.mubr.msk.f32.mxu0 %vm117_vm0, %v78_v11 }
  0x60   :  { %723 = vmatmul.mubr.msk.f32.gmra.mrb[4].mxu0 %vm117_vm0, %v79_v12 }
  0x61   :  { %725 = vmatprep.mubr.msk.f32.mxu0 %vm117_vm0, %v80_v13 }
  0x64   :  { %726 = vmatmul.mubr.msk.f32.gmra.mrb[6].mxu0 %vm117_vm0, %v81_v14 }
  0x65   :  { %728 = vmatprep.mubr.msk.f32.mxu0 %vm117_vm0, %v82_v15 }
  0x68   :  { %729 = vmatmul.mubr.msk.f32.gmra.mrb[8].mxu0 %vm117_vm0, %v83_v16 }
  0x69   :  { %731 = vmatprep.mubr.msk.f32.mxu0 %vm117_vm0, %v84_v17 }
  0x6c   :  { %732 = vmatmul.mubr.msk.f32.gmra.mrb[10].mxu0 %vm117_vm0, %v85_v18 }
  0x6d   :  { %734 = vmatprep.mubr.msk.f32.mxu0 %vm117_vm0, %v86_v19 }
  0x70   :  { %735 = vmatmul.mubr.msk.f32.gmra.mrb[12].mxu0 %vm117_vm0, %v87_v20 }
  0x71   :  { %737 = vmatprep.mubr.msk.f32.mxu0 %vm117_vm0, %v88_v21 }
  0x74   :  { %738 = vmatmul.mubr.msk.f32.gmra.mrb[14].mxu0 %vm117_vm0, %v89_v22 }
  0x75   :  { %740 = vmatprep.mubr.msk.f32.mxu0 %vm117_vm0, %v90_v23 }
  0x78   :  { %741 = vmatmul.mubr.msk.f32.gmra.mrb[16].mxu0 %vm117_vm0, %v91_v24 }
  0x79   :  { %743 = vmatprep.mubr.msk.f32.mxu0 %vm117_vm0, %v92_v25 }
  0x7c   :  { %744 = vmatmul.mubr.msk.f32.gmra.mrb[18].mxu0 %vm117_vm0, %v93_v26 }
  0x7d   :  { %746 = vmatprep.mubr.msk.f32.mxu0 %vm117_vm0, %v94_v27 }
  0x80   :  { %747 = vmatmul.mubr.msk.f32.gmra.mrb[20].mxu0 %vm117_vm0, %v95_v28 }
  0x81   :  { %749 = vmatprep.mubr.msk.f32.mxu0 %vm117_vm0, %v96_v29 }
  0x84   :  { %750 = vmatmul.mubr.msk.f32.gmra.mrb[22].mxu0 %vm117_vm0, %v97_v30 }
  0x85   :  { %752 = vmatprep.mubr.msk.f32.mxu0 %vm117_vm0, %v98_v31 }
  0x88   :  { %753 = vmatmul.mubr.msk.f32.gmra.mrb[24].mxu0 %vm117_vm0, %v99_v32 }
  0x89   :  { %755 = vmatprep.mubr.msk.f32.mxu0 %vm117_vm0, %v100_v33 }
  0x8c   :  { %756 = vmatmul.mubr.msk.f32.gmra.mrb[26].mxu0 %vm117_vm0, %v101_v34 }
  0x8d   :  { %758 = vmatprep.mubr.msk.f32.mxu0 %vm117_vm0, %v102_v35 }
  0x90   :  { %759 = vmatmul.mubr.msk.f32.gmra.mrb[28].mxu0 %vm117_vm0, %v103_v36 }
  0x91   :  { %761 = vmatprep.mubr.msk.f32.mxu0 %vm117_vm0, %v104_v37 }
  0x94   :  { %762 = vmatmul.mubr.msk.f32.gmra.mrb[30].mxu0 %vm117_vm0, %v105_v38 }
 0x12b   :  { %v718_v43 = vpop.f32.mrb[0].mxu0 }
 0x12c   :  { %v286_v44 = vadd.f32 %v718_v43, %v1072_v42  ;;  %v280_v45 = vpop.f32.mrb[1].mxu0 }
 0x12d   :  { %v281_v46 = vadd.f32 %v1072_v42, %v280_v45 }
 0x12e   :  { %v440_v47 = vmax.f32 %v286_v44, 0.0 }
 0x12f   :  { %v439_v48 = vmax.f32 %v281_v46, 0.0  ;;  %v721_v49 = vpop.f32.mrb[2].mxu0 }
 0x130   :  { %v296_v50 = vadd.f32 %v721_v49, %v1072_v42  ;;  %v290_v51 = vpop.f32.mrb[3].mxu0 }
 0x131   :  { %v291_v52 = vadd.f32 %v1072_v42, %v290_v51  ;;  %v774_v53 = vpack.c.bf16 %v440_v47, %v439_v48 }
 0x132   :  { %v442_v54 = vmax.f32 %v296_v50, 0.0 }
 0x133   :  { %v441_v55 = vmax.f32 %v291_v52, 0.0  ;;  %v724_v56 = vpop.f32.mrb[4].mxu0 }
 0x134   :  { %v306_v57 = vadd.f32 %v724_v56, %v1072_v42  ;;  %v300_v58 = vpop.f32.mrb[5].mxu0 }
 0x135   :  { %v1079_v59 = vpack.c.bf16 %v442_v54, %v441_v55  ;;  %v301_v60 = vadd.f32 %v1072_v42, %v300_v58 }
 0x136   :  { %v444_v61 = vmax.f32 %v306_v57, 0.0 }
 0x137   :  { %v443_v62 = vmax.f32 %v301_v60, 0.0  ;;  %v727_v63 = vpop.f32.mrb[6].mxu0 }
 0x138   :  { %v316_v0 = vadd.f32 %v727_v63, %v1072_v42  ;;  %v310_v1 = vpop.f32.mrb[7].mxu0 }
 0x139   :  { %v1083_v2 = vpack.c.bf16 %v444_v61, %v443_v62  ;;  %v311_v3 = vadd.f32 %v1072_v42, %v310_v1 }
 0x13a   :  { %v446_v4 = vmax.f32 %v316_v0, 0.0 }
 0x13b   :  { %v445_v5 = vmax.f32 %v311_v3, 0.0  ;;  %v730_v6 = vpop.f32.mrb[8].mxu0 }
 0x13c   :  { %v326_v7 = vadd.f32 %v730_v6, %v1072_v42  ;;  %v320_v8 = vpop.f32.mrb[9].mxu0 }
 0x13d   :  { %v1087_v9 = vpack.c.bf16 %v446_v4, %v445_v5  ;;  %v321_v10 = vadd.f32 %v1072_v42, %v320_v8 }
 0x13e   :  { %v448_v11 = vmax.f32 %v326_v7, 0.0 }
 0x13f   :  { %v447_v12 = vmax.f32 %v321_v10, 0.0  ;;  %v733_v13 = vpop.f32.mrb[10].mxu0 }
 0x140   :  { %v336_v14 = vadd.f32 %v733_v13, %v1072_v42  ;;  %v330_v15 = vpop.f32.mrb[11].mxu0 }
 0x141   :  { %v1091_v16 = vpack.c.bf16 %v448_v11, %v447_v12  ;;  %v331_v17 = vadd.f32 %v1072_v42, %v330_v15 }
 0x142   :  { %v450_v18 = vmax.f32 %v336_v14, 0.0 }
 0x143   :  { %v449_v19 = vmax.f32 %v331_v17, 0.0  ;;  %v736_v20 = vpop.f32.mrb[12].mxu0 }
 0x144   :  { %v346_v21 = vadd.f32 %v736_v20, %v1072_v42  ;;  %v340_v22 = vpop.f32.mrb[13].mxu0 }
 0x145   :  { %v1095_v23 = vpack.c.bf16 %v450_v18, %v449_v19  ;;  %v341_v24 = vadd.f32 %v1072_v42, %v340_v22 }
 0x146   :  { %v452_v25 = vmax.f32 %v346_v21, 0.0 }
 0x147   :  { %v451_v26 = vmax.f32 %v341_v24, 0.0  ;;  %v739_v27 = vpop.f32.mrb[14].mxu0 }
 0x148   :  { %v356_v28 = vadd.f32 %v739_v27, %v1072_v42  ;;  %v350_v29 = vpop.f32.mrb[15].mxu0 }
 0x149   :  { %v1099_v30 = vpack.c.bf16 %v452_v25, %v451_v26  ;;  %v351_v31 = vadd.f32 %v1072_v42, %v350_v29 }
 0x14a   :  { %v454_v32 = vmax.f32 %v356_v28, 0.0 }
 0x14b   :  { %v453_v33 = vmax.f32 %v351_v31, 0.0  ;;  %v742_v34 = vpop.f32.mrb[16].mxu0 }
 0x14c   :  { %v366_v35 = vadd.f32 %v742_v34, %v1072_v42  ;;  %v360_v36 = vpop.f32.mrb[17].mxu0 }
 0x14d   :  { %v1103_v37 = vpack.c.bf16 %v454_v32, %v453_v33  ;;  %v361_v38 = vadd.f32 %v1072_v42, %v360_v36 }
 0x14e   :  { %v456_v40 = vmax.f32 %v366_v35, 0.0  ;;  %v547_v35 = vpop.permute.xlu0 %546 }
 0x14f   :  { %v455_v41 = vmax.f32 %v361_v38, 0.0  ;;  %v745_v43 = vpop.f32.mrb[18].mxu0 }
 0x150   :  { %v376_v44 = vadd.f32 %v745_v43, %v1072_v42  ;;  %v370_v45 = vpop.f32.mrb[19].mxu0 }
 0x151   :  { %v371_v46 = vadd.f32 %v1072_v42, %v370_v45  ;;  %v772_v47 = vpack.c.bf16 %v456_v40, %v455_v41 }
 0x152   :  { %v458_v48 = vmax.f32 %v376_v44, 0.0 }
 0x153   :  { %v457_v49 = vmax.f32 %v371_v46, 0.0  ;;  %773 = vmatprep.subr.bf16.mxu1 %v772_v47  ;;  %v748_v50 = vpop.f32.mrb[20].mxu0 }
 0x154   :  { %775 = vmatpush3.bf16.xpose.msra.mxu1 %v774_v53  ;;  %v386_v51 = vadd.f32 %v748_v50, %v1072_v42  ;;  %v380_v52 = vpop.f32.mrb[21].mxu0 }
 0x155   :  { %v776_v54 = vpack.c.bf16 %v458_v48, %v457_v49  ;;  %v381_v55 = vadd.f32 %v1072_v42, %v380_v52 }
 0x156   :  { %v460_v56 = vmax.f32 %v386_v51, 0.0 }
 0x157   :  { %777 = vmatprep.subr.bf16.mxu1 %v776_v54  ;;  %v459_v57 = vmax.f32 %v381_v55, 0.0  ;;  %v751_v58 = vpop.f32.mrb[22].mxu0 }
 0x158   :  { %v396_v60 = vadd.f32 %v751_v58, %v1072_v42  ;;  %v390_v61 = vpop.f32.mrb[23].mxu0 }
 0x159   :  { %v780_v62 = vpack.c.bf16 %v460_v56, %v459_v57  ;;  %v391_v63 = vadd.f32 %v1072_v42, %v390_v61 }
 0x15a   :  { %v462_v0 = vmax.f32 %v396_v60, 0.0 }
 0x15b   :  { %v461_v1 = vmax.f32 %v391_v63, 0.0  ;;  %v754_v3 = vpop.f32.mrb[24].mxu0 }
 0x15c   :  { %779 = vmatpush3.bf16.xpose.msra.mxu1 %v1079_v59  ;;  %v406_v53 = vadd.f32 %v754_v3, %v1072_v42  ;;  %v400_v4 = vpop.f32.mrb[25].mxu0 }
 0x15d   :  { %781 = vmatprep.subr.bf16.mxu1 %v780_v62  ;;  %v784_v5 = vpack.c.bf16 %v462_v0, %v461_v1  ;;  %v401_v6 = vadd.f32 %v1072_v42, %v400_v4 }
 0x15e   :  { %v464_v7 = vmax.f32 %v406_v53, 0.0 }
 0x15f   :  { %v463_v8 = vmax.f32 %v401_v6, 0.0  ;;  %v757_v10 = vpop.f32.mrb[26].mxu0 }
 0x160   :  { %v416_v11 = vadd.f32 %v757_v10, %v1072_v42  ;;  %v410_v12 = vpop.f32.mrb[27].mxu0 }
 0x161   :  { %v788_v13 = vpack.c.bf16 %v464_v7, %v463_v8  ;;  %v411_v14 = vadd.f32 %v1072_v42, %v410_v12 }
 0x162   :  { %v466_v15 = vmax.f32 %v416_v11, 0.0 }
 0x163   :  { %v465_v17 = vmax.f32 %v411_v14, 0.0  ;;  %v760_v18 = vpop.f32.mrb[28].mxu0 }
 0x164   :  { %783 = vmatpush3.bf16.xpose.msra.mxu1 %v1083_v2  ;;  %v426_v59 = vadd.f32 %v760_v18, %v1072_v42  ;;  %v420_v19 = vpop.f32.mrb[29].mxu0 }
 0x165   :  { %785 = vmatprep.subr.bf16.mxu1 %v784_v5  ;;  %v792_v20 = vpack.c.bf16 %v466_v15, %v465_v17  ;;  %v421_v21 = vadd.f32 %v1072_v42, %v420_v19 }
 0x166   :  { %v468_v22 = vmax.f32 %v426_v59, 0.0 }
 0x167   :  { %v467_v24 = vmax.f32 %v421_v21, 0.0  ;;  %v763_v25 = vpop.f32.mrb[30].mxu0 }
 0x168   :  { %v436_v26 = vadd.f32 %v763_v25, %v1072_v42  ;;  %v430_v27 = vpop.f32.mrb[31].mxu0 }
 0x169   :  { %v796_v28 = vpack.c.bf16 %v468_v22, %v467_v24  ;;  %v431_v29 = vadd.f32 %v1072_v42, %v430_v27  ;;  %v549_v42 = vlaneseq }
 0x16a   :  { %v470_v31 = vmax.f32 %v436_v26, 0.0 }
 0x16b   :  { %v469_v32 = vmax.f32 %v431_v29, 0.0  ;;  %v550_v33 = vshrl.u32 %v549_v42, 7  ;;  %vm585_vm1 = vcmp.lt.s32.totalorder %v549_v42, 256 }
 0x16c   :  { %787 = vmatpush3.bf16.xpose.msra.mxu1 %v1087_v9 }
 0x16d   :  { %789 = vmatprep.subr.bf16.mxu1 %v788_v13  ;;  %v800_v2 = vpack.c.bf16 %v470_v31, %v469_v32  ;;  %v551_v34 = vsub.s32 0, %v550_v33 }
 0x16f   :  { %v552_v9 = vrot.slane %v547_v35, %v551_v34 }
 0x174   :  { %791 = vmatpush3.bf16.xpose.msra.mxu1 %v1091_v16 }
 0x175   :  { %793 = vmatprep.subr.bf16.mxu1 %v792_v20 }
 0x17c   :  { %795 = vmatpush3.bf16.xpose.msra.mxu1 %v1095_v23 }
 0x17d   :  { %797 = vmatprep.subr.bf16.mxu1 %v796_v28 }
 0x184   :  { %799 = vmatpush3.bf16.xpose.msra.mxu1 %v1099_v30 }
 0x185   :  { %801 = vmatprep.subr.bf16.mxu1 %v800_v2 }
 0x18c   :  { %803 = vmatpush3.bf16.xpose.msra.mxu1 %v1103_v37 }
 0x193   :  { %707 = vmatmul.mubr.f32.vlgmr.msra.gmra.mrb[0].mxu1 %v1069_v39  ;;  %v947_v39 = vmov 1966171168  }
 0x194   :  { %v569_v47 = vunpack.c.l.s4 %v947_v39 }
 0x196   :  { %v570_v48 = vunpack.c.0.s8 %v569_v47 }
 0x198   :  { %v573_v50 = vsub.s32 %v570_v48, %v550_v33 }
 0x266   :  { %v538_v36 = vpop.f32.mrb[0].mxu1 }
 0x267   :  { %v553_v38 = vadd.f32 %v552_v9, %v538_v36  ;;  %v540_v40 = vpop.f32.mrb[1].mxu1 }
 0x268   :  { %v554_v16 = vadd.f32 %v552_v9, %v540_v40 }
 0x269   :  { %v555_v41 = vsub.f32 0.0, %v553_v38 }
 0x26a   :  { %v556_v43 = vsub.f32 0.0, %v554_v16 }
 0x26b   :  { %v557_v23 = vmul.f32 1.442695, %v555_v41 }
 0x26c   :  { %v559_v44 = vmul.f32 1.442695, %v556_v43 }
 0x26d   :  { %814 = vpow2.f32 %v557_v23 }
 0x26e   :  { %816 = vpow2.f32 %v559_v44 }
 0x277   :  { %v815_v30 = vpop.eup %814 }
 0x278   :  { %v817_v45 = vpop.eup %816  ;;  %v561_v37 = vadd.f32 1.0, %v815_v30 }
 0x279   :  { %v562_v46 = vadd.f32 1.0, %v817_v45 }
 0x27a   :  { %818 = vrcp.f32 %v561_v37 }
 0x27b   :  { %820 = vrcp.f32 %v562_v46 }
 0x284   :  { %v819_v49 = vpop.eup %818 }
 0x285   :  { %v821_v51 = vpop.eup %820 }
 0x286   :  { %v567_v52 = vcombine.low %v819_v49, %v821_v51 }
 0x288   :  { %v574_v54 = vrot.slane %v567_v52, %v573_v50 }
 0x28a   :  { %v581_v55 = vrot.slane %v574_v54, %v573_v50 }
 0x28c   :  { %587 = vst.msk [vmem:[#allocation11] sm:$0x3] %vm585_vm1, %v581_v55 }
 0x28d   :  { %921 = shalt.err (!%p918_p8)
}
 0x28e   :  { %s922_s19 = scalar_lea.hbm %s1145_s5, 32 }
 0x28f   :  { %p923_p9 = scmp.ne.s32.totalorder %s1145_s5, %s922_s19  ;;  %p926_p10 = scmp.lt.u32.totalorder %s922_s19, %s1145_s5 }
 0x291   :  { %p928_p11 = pnand %p926_p10, %p923_p9 }
 0x293   :  { %931 = shalt.err (!%p928_p11)
}
 0x294   :  { %597 = dma.vmem_to_hbm [thread:$0]  %s595_s16, 32, %s1145_s5, [#allocation5]  }
 0x295   :  { %938 = dma.done.wait [#allocation5], 32  }
 0x296   :  { %939 = vsyncadd [#allocation5], 4294967264 }
 0x297   :  { %601 = vsyncpa [#allocation4], 1 }
 0x298   :  { %602 = vsyncpa [#allocation7], 1 }
 0x299   :  { %603 = vsyncpa [#allocation10], 1 }
 0x29a   :  { %604 = vsyncpa [#allocation5], 1 }

</bundles_post_ra>
